<compile_context>
chip_gen: v5e
topology: v5e:2x2
jax: 0.10.0
libtpu: 0.0.40
codegen_flags: <defaults>
</compile_context>

<pallas_src>
import jax
import jax.numpy as jnp
from jax.experimental import pallas as pl
from jax.experimental.pallas import tpu as pltpu
import numpy as np

# ---------------- problem sizes (small, consistent with the module) ----------
B = 2                          # batch
T = 8                          # num_tokens == context_length
D_IN = 32                      # d_in
D_OUT = 32                     # d_out
NUM_HEADS = 4
HEAD_DIM = D_OUT // NUM_HEADS  # 8
N = B * T                      # flattened (batch * tokens) rows
DROPOUT = 0.0
NEG_BIG = -1e30                # finite additive mask value (no -inf hazards)


# ---------------- Pallas kernel ----------------------------------------------
def mha_kernel(x_ref, wqkv_ref, wo_ref, bo_ref, bias_ref, o_ref):
    """Single invocation over the whole (flattened) problem.

    x_ref    : (N, D_IN)                  VMEM bf16  (N = B*T)
    wqkv_ref : (D_IN, 3*D_OUT)            VMEM bf16  fused [Q|K|V], x@W layout,
                                                     1/sqrt(hd) folded into Q cols
    wo_ref   : (NUM_HEADS, HEAD_DIM, D_OUT) VMEM bf16  out_proj split per head,
                                                     x@W layout
    bo_ref   : (1, D_OUT)                 VMEM f32
    bias_ref : (N, N)                     VMEM f32   additive causal/batch mask
    o_ref    : (N, D_OUT)                 VMEM f32
    """
    x = x_ref[...]                                                    # bf16

    # One fused lane-dense QKV matmul (bf16 x bf16 -> f32 accumulate).
    qkv = jnp.dot(x, wqkv_ref[...],
                  preferred_element_type=jnp.float32)                 # (N, 3*D_OUT) f32

    bias = bias_ref[...]                                              # (N, N) f32, loaded once

    # out_proj decomposed per head:
    #   concat(ctx_h) @ Wo  ==  sum_h ctx_h @ Wo[h*hd:(h+1)*hd, :]
    # so no lane concat / reshape of head outputs is ever materialized.
    acc = jnp.broadcast_to(bo_ref[...], (N, D_OUT)).astype(jnp.float32)

    for h in range(NUM_HEADS):                     # static unroll, 4 heads
        s = h * HEAD_DIM
        q_h = qkv[:, s:s + HEAD_DIM].astype(jnp.bfloat16)             # scale pre-folded
        k_h = qkv[:, D_OUT + s:D_OUT + s + HEAD_DIM].astype(jnp.bfloat16)
        v_h = qkv[:, 2 * D_OUT + s:2 * D_OUT + s + HEAD_DIM].astype(jnp.bfloat16)

        # q . k^T expressed as a dot_general contracting the last dims of both
        # (no materialized transpose), f32 accumulation.
        scores = jax.lax.dot_general(
            q_h, k_h, (((1,), (1,)), ((), ())),
            preferred_element_type=jnp.float32) + bias                # (N, N) f32

        # Numerically-stable softmax, all in f32 (v5e-safe).
        m = jnp.max(scores, axis=-1, keepdims=True)
        p = jnp.exp(scores - m)
        l = jnp.sum(p, axis=-1, keepdims=True)
        attn = (p * pl.reciprocal(l, approx=True)).astype(jnp.bfloat16)
        # TODO(synk): training-mode dropout (p > 0) on attn is not implemented.

        ctx_h = jnp.dot(attn, v_h,
                        preferred_element_type=jnp.float32)           # (N, HEAD_DIM) f32
        wo_h = wo_ref[h]                                              # (HEAD_DIM, D_OUT) bf16
        acc = acc + jnp.dot(ctx_h.astype(jnp.bfloat16), wo_h,
                            preferred_element_type=jnp.float32)

    o_ref[...] = acc.astype(o_ref.dtype)


# ---------------- host-side packing (called ONCE, outside the hot path) ------
def pack_params(wq, wk, wv, wo, bo):
    """wq/wk/wv: (H, HEAD_DIM, D_IN) nn.Linear layout; wo: (D_OUT, D_OUT); bo: (D_OUT,).

    Returns kernel-ready constants:
      wqkv     (D_IN, 3*D_OUT) bf16, x@W layout, Q columns pre-scaled by 1/sqrt(hd)
      wo_heads (H, HEAD_DIM, D_OUT) bf16, x@W layout, split per head
      bo2d     (1, D_OUT) f32
    """
    scale = 1.0 / (HEAD_DIM ** 0.5)

    def flat(w):
        # (H, HEAD_DIM, D_IN) -> (D_IN, H, HEAD_DIM) -> (D_IN, H*HEAD_DIM)
        return jnp.transpose(w, (2, 0, 1)).reshape(D_IN, NUM_HEADS * HEAD_DIM)

    wqkv = jnp.concatenate([flat(wq) * scale, flat(wk), flat(wv)], axis=1)
    wo_heads = wo.T.reshape(NUM_HEADS, HEAD_DIM, D_OUT)   # x@W layout, per-head row blocks
    return (wqkv.astype(jnp.bfloat16),
            wo_heads.astype(jnp.bfloat16),
            bo.reshape(1, D_OUT).astype(jnp.float32))


def make_causal_bias():
    """Block-diagonal causal additive bias over the flattened (B*T) rows."""
    row = np.arange(N)[:, None]
    col = np.arange(N)[None, :]
    disallow = (col > row) | ((row // T) != (col // T))
    return jnp.asarray(np.where(disallow, NEG_BIG, 0.0), dtype=np.float32)


# ---------------- wrapper -----------------------------------------------------
@jax.jit
def multi_head_attention(x, wqkv, wo_heads, bo2d, bias):
    """x: (B, T, D_IN) f32; remaining args are the pre-packed constants."""
    x2d = x.reshape(N, D_IN).astype(jnp.bfloat16)

    out2d = pl.pallas_call(
        mha_kernel,
        out_shape=jax.ShapeDtypeStruct((N, D_OUT), jnp.float32),
        grid=(1,),
        in_specs=[
            pl.BlockSpec((N, D_IN), lambda i: (0, 0)),
            pl.BlockSpec((D_IN, 3 * D_OUT), lambda i: (0, 0)),
            pl.BlockSpec((NUM_HEADS, HEAD_DIM, D_OUT), lambda i: (0, 0, 0)),
            pl.BlockSpec((1, D_OUT), lambda i: (0, 0)),
            pl.BlockSpec((N, N), lambda i: (0, 0)),
        ],
        out_specs=pl.BlockSpec((N, D_OUT), lambda i: (0, 0)),
        compiler_params=pltpu.CompilerParams(
            dimension_semantics=("arbitrary",)),
    )(x2d, wqkv, wo_heads, bo2d, bias)
    return out2d.reshape(B, T, D_OUT)


# ---------------- pure-JAX reference (mirrors the PyTorch forward) -----------
def reference(x, wq, wk, wv, wo, bo):
    outs = []
    mask = jnp.triu(jnp.ones((T, T), dtype=bool), k=1)
    for h in range(NUM_HEADS):
        q = x @ wq[h].T                   # nn.Linear: y = x @ W.T
        k = x @ wk[h].T
        v = x @ wv[h].T
        scores = q @ jnp.swapaxes(k, 1, 2)
        scores = jnp.where(mask, -jnp.inf, scores)
        w = jax.nn.softmax(scores / (HEAD_DIM ** 0.5), axis=-1)
        outs.append(w @ v)
    concat = jnp.concatenate(outs, axis=-1)
    return concat @ wo.T + bo[None, None, :]


if __name__ == "__main__":
    key = jax.random.PRNGKey(0)
    kx, kq, kk, kv, kw, kb = jax.random.split(key, 6)

    x = jax.random.normal(kx, (B, T, D_IN), dtype=jnp.float32)

    # Synthetic parameters in nn.Linear (out_features, in_features) layout,
    # stacked per head -- shapes implied by the module __init__.
    wq = 0.05 * jax.random.normal(kq, (NUM_HEADS, HEAD_DIM, D_IN), dtype=jnp.float32)
    wk = 0.05 * jax.random.normal(kk, (NUM_HEADS, HEAD_DIM, D_IN), dtype=jnp.float32)
    wv = 0.05 * jax.random.normal(kv, (NUM_HEADS, HEAD_DIM, D_IN), dtype=jnp.float32)
    wo = 0.05 * jax.random.normal(kw, (D_OUT, D_OUT), dtype=jnp.float32)
    bo = 0.05 * jax.random.normal(kb, (D_OUT,), dtype=jnp.float32)

    # One-time init-path packing (hoisted out of the per-call hot path).
    wqkv, wo_heads, bo2d = pack_params(wq, wk, wv, wo, bo)
    bias = make_causal_bias()

    out = multi_head_attention(x, wqkv, wo_heads, bo2d, bias)
    out = jax.block_until_ready(out)

    ref = reference(x, wq, wk, wv, wo, bo)
    # Tolerance relaxed because all MXU operands are bf16 (f32 accumulate) and
    # the softmax denominator uses the EUP approximate reciprocal.
    np.testing.assert_allclose(np.asarray(out), np.asarray(ref), rtol=2e-2, atol=2e-2)

    print("KERNEL_OK")
</pallas_src>

<mosaic_0001>
module attributes {stable_mosaic.version = 11 : i64} {
  func.func @mha_kernel(%arg0: i32, %arg1: memref<16x32xbf16, #tpu.memory_space<vmem>>, %arg2: memref<32x96xbf16, #tpu.memory_space<vmem>>, %arg3: memref<4x8x32xbf16, #tpu.memory_space<vmem>>, %arg4: memref<1x32xf32, #tpu.memory_space<vmem>>, %arg5: memref<16x16xf32, #tpu.memory_space<vmem>>, %arg6: memref<16x32xf32, #tpu.memory_space<vmem>>) attributes {dimension_semantics = [#tpu.dimension_semantics<arbitrary>], iteration_bounds = array<i64: 1>, scalar_prefetch = 0 : i64, scratch_operands = 0 : i64, tpu.core_type = #tpu.core_type<tc>, window_params = [{pipeline_mode = #tpu.pipeline_mode<synchronous>, transform_indices = @transform_0, window_bounds = array<i64: 16, 32>}, {pipeline_mode = #tpu.pipeline_mode<synchronous>, transform_indices = @transform_1, window_bounds = array<i64: 32, 96>}, {pipeline_mode = #tpu.pipeline_mode<synchronous>, transform_indices = @transform_2, window_bounds = array<i64: 4, 8, 32>}, {pipeline_mode = #tpu.pipeline_mode<synchronous>, transform_indices = @transform_3, window_bounds = array<i64: 1, 32>}, {pipeline_mode = #tpu.pipeline_mode<synchronous>, transform_indices = @transform_4, window_bounds = array<i64: 16, 16>}, {pipeline_mode = #tpu.pipeline_mode<synchronous>, transform_indices = @transform_5, window_bounds = array<i64: 16, 32>}]} {
    %c0 = arith.constant 0 : index
    %c0_0 = arith.constant 0 : index
    %0 = vector.load %arg1[%c0, %c0_0] : memref<16x32xbf16, #tpu.memory_space<vmem>>, vector<16x32xbf16>
    %c0_1 = arith.constant 0 : index
    %c0_2 = arith.constant 0 : index
    %1 = vector.load %arg2[%c0_1, %c0_2] : memref<32x96xbf16, #tpu.memory_space<vmem>>, vector<32x96xbf16>
    %cst = arith.constant dense<0.000000e+00> : vector<16x96xf32>
    %2 = tpu.matmul %0, %1, %cst {dimension_numbers = #tpu.dot_dimension_numbers<[1], [0], [0], [1], [0, 0, 1, 1], [], []>} : vector<16x32xbf16>, vector<32x96xbf16>, vector<16x96xf32> -> vector<16x96xf32>
    %c0_3 = arith.constant 0 : index
    %c0_4 = arith.constant 0 : index
    %3 = vector.load %arg5[%c0_3, %c0_4] : memref<16x16xf32, #tpu.memory_space<vmem>>, vector<16x16xf32>
    %c0_5 = arith.constant 0 : index
    %c0_6 = arith.constant 0 : index
    %4 = vector.load %arg4[%c0_5, %c0_6] : memref<1x32xf32, #tpu.memory_space<vmem>>, vector<1x32xf32>
    %5 = vector.shape_cast %4 : vector<1x32xf32> to vector<1x32xf32>
    %6 = vector.broadcast %5 : vector<1x32xf32> to vector<16x32xf32>
    %7 = vector.extract_strided_slice %2 {offsets = [0, 0], sizes = [16, 8], strides = [1, 1]} : vector<16x96xf32> to vector<16x8xf32>
    %8 = arith.truncf %7 : vector<16x8xf32> to vector<16x8xbf16>
    %9 = vector.extract_strided_slice %2 {offsets = [0, 32], sizes = [16, 8], strides = [1, 1]} : vector<16x96xf32> to vector<16x8xf32>
    %10 = arith.truncf %9 : vector<16x8xf32> to vector<16x8xbf16>
    %11 = vector.extract_strided_slice %2 {offsets = [0, 64], sizes = [16, 8], strides = [1, 1]} : vector<16x96xf32> to vector<16x8xf32>
    %12 = arith.truncf %11 : vector<16x8xf32> to vector<16x8xbf16>
    %cst_7 = arith.constant dense<0.000000e+00> : vector<16x16xf32>
    %13 = tpu.matmul %8, %10, %cst_7 {dimension_numbers = #tpu.dot_dimension_numbers<[1], [1], [0], [0], [0, 0, 1, 0], [], []>} : vector<16x8xbf16>, vector<16x8xbf16>, vector<16x16xf32> -> vector<16x16xf32>
    %14 = arith.addf %13, %3 : vector<16x16xf32>
    %cst_8 = arith.constant dense<0xFF800000> : vector<16xf32>
    %15 = vector.multi_reduction <maximumf>, %14, %cst_8 [1] : vector<16x16xf32> to vector<16xf32>
    %16 = vector.shape_cast %15 : vector<16xf32> to vector<16x1xf32>
    %17 = vector.broadcast %16 : vector<16x1xf32> to vector<16x16xf32>
    %18 = arith.subf %14, %17 : vector<16x16xf32>
    %19 = math.exp %18 : vector<16x16xf32>
    %cst_9 = arith.constant dense<0.000000e+00> : vector<16xf32>
    %20 = vector.multi_reduction <add>, %19, %cst_9 [1] : vector<16x16xf32> to vector<16xf32>
    %21 = vector.shape_cast %20 : vector<16xf32> to vector<16x1xf32>
    %22 = tpu.reciprocal %21 {approx = true} : vector<16x1xf32> -> vector<16x1xf32>
    %23 = vector.broadcast %22 : vector<16x1xf32> to vector<16x16xf32>
    %24 = arith.mulf %19, %23 : vector<16x16xf32>
    %25 = arith.truncf %24 : vector<16x16xf32> to vector<16x16xbf16>
    %cst_10 = arith.constant dense<0.000000e+00> : vector<16x8xf32>
    %26 = tpu.matmul %25, %12, %cst_10 {dimension_numbers = #tpu.dot_dimension_numbers<[1], [0], [0], [1], [0, 0, 1, 1], [], []>} : vector<16x16xbf16>, vector<16x8xbf16>, vector<16x8xf32> -> vector<16x8xf32>
    %c0_11 = arith.constant 0 : index
    %c0_12 = arith.constant 0 : index
    %c0_13 = arith.constant 0 : index
    %27 = vector.load %arg3[%c0_11, %c0_12, %c0_13] : memref<4x8x32xbf16, #tpu.memory_space<vmem>>, vector<1x8x32xbf16>
    %28 = vector.shape_cast %27 : vector<1x8x32xbf16> to vector<8x32xbf16>
    %29 = arith.truncf %26 : vector<16x8xf32> to vector<16x8xbf16>
    %cst_14 = arith.constant dense<0.000000e+00> : vector<16x32xf32>
    %30 = tpu.matmul %29, %28, %cst_14 {dimension_numbers = #tpu.dot_dimension_numbers<[1], [0], [0], [1], [0, 0, 1, 1], [], []>} : vector<16x8xbf16>, vector<8x32xbf16>, vector<16x32xf32> -> vector<16x32xf32>
    %31 = arith.addf %6, %30 : vector<16x32xf32>
    %32 = vector.extract_strided_slice %2 {offsets = [0, 8], sizes = [16, 8], strides = [1, 1]} : vector<16x96xf32> to vector<16x8xf32>
    %33 = arith.truncf %32 : vector<16x8xf32> to vector<16x8xbf16>
    %34 = vector.extract_strided_slice %2 {offsets = [0, 40], sizes = [16, 8], strides = [1, 1]} : vector<16x96xf32> to vector<16x8xf32>
    %35 = arith.truncf %34 : vector<16x8xf32> to vector<16x8xbf16>
    %36 = vector.extract_strided_slice %2 {offsets = [0, 72], sizes = [16, 8], strides = [1, 1]} : vector<16x96xf32> to vector<16x8xf32>
    %37 = arith.truncf %36 : vector<16x8xf32> to vector<16x8xbf16>
    %cst_15 = arith.constant dense<0.000000e+00> : vector<16x16xf32>
    %38 = tpu.matmul %33, %35, %cst_15 {dimension_numbers = #tpu.dot_dimension_numbers<[1], [1], [0], [0], [0, 0, 1, 0], [], []>} : vector<16x8xbf16>, vector<16x8xbf16>, vector<16x16xf32> -> vector<16x16xf32>
    %39 = arith.addf %38, %3 : vector<16x16xf32>
    %cst_16 = arith.constant dense<0xFF800000> : vector<16xf32>
    %40 = vector.multi_reduction <maximumf>, %39, %cst_16 [1] : vector<16x16xf32> to vector<16xf32>
    %41 = vector.shape_cast %40 : vector<16xf32> to vector<16x1xf32>
    %42 = vector.broadcast %41 : vector<16x1xf32> to vector<16x16xf32>
    %43 = arith.subf %39, %42 : vector<16x16xf32>
    %44 = math.exp %43 : vector<16x16xf32>
    %cst_17 = arith.constant dense<0.000000e+00> : vector<16xf32>
    %45 = vector.multi_reduction <add>, %44, %cst_17 [1] : vector<16x16xf32> to vector<16xf32>
    %46 = vector.shape_cast %45 : vector<16xf32> to vector<16x1xf32>
    %47 = tpu.reciprocal %46 {approx = true} : vector<16x1xf32> -> vector<16x1xf32>
    %48 = vector.broadcast %47 : vector<16x1xf32> to vector<16x16xf32>
    %49 = arith.mulf %44, %48 : vector<16x16xf32>
    %50 = arith.truncf %49 : vector<16x16xf32> to vector<16x16xbf16>
    %cst_18 = arith.constant dense<0.000000e+00> : vector<16x8xf32>
    %51 = tpu.matmul %50, %37, %cst_18 {dimension_numbers = #tpu.dot_dimension_numbers<[1], [0], [0], [1], [0, 0, 1, 1], [], []>} : vector<16x16xbf16>, vector<16x8xbf16>, vector<16x8xf32> -> vector<16x8xf32>
    %c1 = arith.constant 1 : index
    %c0_19 = arith.constant 0 : index
    %c0_20 = arith.constant 0 : index
    %52 = vector.load %arg3[%c1, %c0_19, %c0_20] : memref<4x8x32xbf16, #tpu.memory_space<vmem>>, vector<1x8x32xbf16>
    %53 = vector.shape_cast %52 : vector<1x8x32xbf16> to vector<8x32xbf16>
    %54 = arith.truncf %51 : vector<16x8xf32> to vector<16x8xbf16>
    %cst_21 = arith.constant dense<0.000000e+00> : vector<16x32xf32>
    %55 = tpu.matmul %54, %53, %cst_21 {dimension_numbers = #tpu.dot_dimension_numbers<[1], [0], [0], [1], [0, 0, 1, 1], [], []>} : vector<16x8xbf16>, vector<8x32xbf16>, vector<16x32xf32> -> vector<16x32xf32>
    %56 = arith.addf %31, %55 : vector<16x32xf32>
    %57 = vector.extract_strided_slice %2 {offsets = [0, 16], sizes = [16, 8], strides = [1, 1]} : vector<16x96xf32> to vector<16x8xf32>
    %58 = arith.truncf %57 : vector<16x8xf32> to vector<16x8xbf16>
    %59 = vector.extract_strided_slice %2 {offsets = [0, 48], sizes = [16, 8], strides = [1, 1]} : vector<16x96xf32> to vector<16x8xf32>
    %60 = arith.truncf %59 : vector<16x8xf32> to vector<16x8xbf16>
    %61 = vector.extract_strided_slice %2 {offsets = [0, 80], sizes = [16, 8], strides = [1, 1]} : vector<16x96xf32> to vector<16x8xf32>
    %62 = arith.truncf %61 : vector<16x8xf32> to vector<16x8xbf16>
    %cst_22 = arith.constant dense<0.000000e+00> : vector<16x16xf32>
    %63 = tpu.matmul %58, %60, %cst_22 {dimension_numbers = #tpu.dot_dimension_numbers<[1], [1], [0], [0], [0, 0, 1, 0], [], []>} : vector<16x8xbf16>, vector<16x8xbf16>, vector<16x16xf32> -> vector<16x16xf32>
    %64 = arith.addf %63, %3 : vector<16x16xf32>
    %cst_23 = arith.constant dense<0xFF800000> : vector<16xf32>
    %65 = vector.multi_reduction <maximumf>, %64, %cst_23 [1] : vector<16x16xf32> to vector<16xf32>
    %66 = vector.shape_cast %65 : vector<16xf32> to vector<16x1xf32>
    %67 = vector.broadcast %66 : vector<16x1xf32> to vector<16x16xf32>
    %68 = arith.subf %64, %67 : vector<16x16xf32>
    %69 = math.exp %68 : vector<16x16xf32>
    %cst_24 = arith.constant dense<0.000000e+00> : vector<16xf32>
    %70 = vector.multi_reduction <add>, %69, %cst_24 [1] : vector<16x16xf32> to vector<16xf32>
    %71 = vector.shape_cast %70 : vector<16xf32> to vector<16x1xf32>
    %72 = tpu.reciprocal %71 {approx = true} : vector<16x1xf32> -> vector<16x1xf32>
    %73 = vector.broadcast %72 : vector<16x1xf32> to vector<16x16xf32>
    %74 = arith.mulf %69, %73 : vector<16x16xf32>
    %75 = arith.truncf %74 : vector<16x16xf32> to vector<16x16xbf16>
    %cst_25 = arith.constant dense<0.000000e+00> : vector<16x8xf32>
    %76 = tpu.matmul %75, %62, %cst_25 {dimension_numbers = #tpu.dot_dimension_numbers<[1], [0], [0], [1], [0, 0, 1, 1], [], []>} : vector<16x16xbf16>, vector<16x8xbf16>, vector<16x8xf32> -> vector<16x8xf32>
    %c2 = arith.constant 2 : index
    %c0_26 = arith.constant 0 : index
    %c0_27 = arith.constant 0 : index
    %77 = vector.load %arg3[%c2, %c0_26, %c0_27] : memref<4x8x32xbf16, #tpu.memory_space<vmem>>, vector<1x8x32xbf16>
    %78 = vector.shape_cast %77 : vector<1x8x32xbf16> to vector<8x32xbf16>
    %79 = arith.truncf %76 : vector<16x8xf32> to vector<16x8xbf16>
    %cst_28 = arith.constant dense<0.000000e+00> : vector<16x32xf32>
    %80 = tpu.matmul %79, %78, %cst_28 {dimension_numbers = #tpu.dot_dimension_numbers<[1], [0], [0], [1], [0, 0, 1, 1], [], []>} : vector<16x8xbf16>, vector<8x32xbf16>, vector<16x32xf32> -> vector<16x32xf32>
    %81 = arith.addf %56, %80 : vector<16x32xf32>
    %82 = vector.extract_strided_slice %2 {offsets = [0, 24], sizes = [16, 8], strides = [1, 1]} : vector<16x96xf32> to vector<16x8xf32>
    %83 = arith.truncf %82 : vector<16x8xf32> to vector<16x8xbf16>
    %84 = vector.extract_strided_slice %2 {offsets = [0, 56], sizes = [16, 8], strides = [1, 1]} : vector<16x96xf32> to vector<16x8xf32>
    %85 = arith.truncf %84 : vector<16x8xf32> to vector<16x8xbf16>
    %86 = vector.extract_strided_slice %2 {offsets = [0, 88], sizes = [16, 8], strides = [1, 1]} : vector<16x96xf32> to vector<16x8xf32>
    %87 = arith.truncf %86 : vector<16x8xf32> to vector<16x8xbf16>
    %cst_29 = arith.constant dense<0.000000e+00> : vector<16x16xf32>
    %88 = tpu.matmul %83, %85, %cst_29 {dimension_numbers = #tpu.dot_dimension_numbers<[1], [1], [0], [0], [0, 0, 1, 0], [], []>} : vector<16x8xbf16>, vector<16x8xbf16>, vector<16x16xf32> -> vector<16x16xf32>
    %89 = arith.addf %88, %3 : vector<16x16xf32>
    %cst_30 = arith.constant dense<0xFF800000> : vector<16xf32>
    %90 = vector.multi_reduction <maximumf>, %89, %cst_30 [1] : vector<16x16xf32> to vector<16xf32>
    %91 = vector.shape_cast %90 : vector<16xf32> to vector<16x1xf32>
    %92 = vector.broadcast %91 : vector<16x1xf32> to vector<16x16xf32>
    %93 = arith.subf %89, %92 : vector<16x16xf32>
    %94 = math.exp %93 : vector<16x16xf32>
    %cst_31 = arith.constant dense<0.000000e+00> : vector<16xf32>
    %95 = vector.multi_reduction <add>, %94, %cst_31 [1] : vector<16x16xf32> to vector<16xf32>
    %96 = vector.shape_cast %95 : vector<16xf32> to vector<16x1xf32>
    %97 = tpu.reciprocal %96 {approx = true} : vector<16x1xf32> -> vector<16x1xf32>
    %98 = vector.broadcast %97 : vector<16x1xf32> to vector<16x16xf32>
    %99 = arith.mulf %94, %98 : vector<16x16xf32>
    %100 = arith.truncf %99 : vector<16x16xf32> to vector<16x16xbf16>
    %cst_32 = arith.constant dense<0.000000e+00> : vector<16x8xf32>
    %101 = tpu.matmul %100, %87, %cst_32 {dimension_numbers = #tpu.dot_dimension_numbers<[1], [0], [0], [1], [0, 0, 1, 1], [], []>} : vector<16x16xbf16>, vector<16x8xbf16>, vector<16x8xf32> -> vector<16x8xf32>
    %c3 = arith.constant 3 : index
    %c0_33 = arith.constant 0 : index
    %c0_34 = arith.constant 0 : index
    %102 = vector.load %arg3[%c3, %c0_33, %c0_34] : memref<4x8x32xbf16, #tpu.memory_space<vmem>>, vector<1x8x32xbf16>
    %103 = vector.shape_cast %102 : vector<1x8x32xbf16> to vector<8x32xbf16>
    %104 = arith.truncf %101 : vector<16x8xf32> to vector<16x8xbf16>
    %cst_35 = arith.constant dense<0.000000e+00> : vector<16x32xf32>
    %105 = tpu.matmul %104, %103, %cst_35 {dimension_numbers = #tpu.dot_dimension_numbers<[1], [0], [0], [1], [0, 0, 1, 1], [], []>} : vector<16x8xbf16>, vector<8x32xbf16>, vector<16x32xf32> -> vector<16x32xf32>
    %106 = arith.addf %81, %105 : vector<16x32xf32>
    %c0_36 = arith.constant 0 : index
    %c0_37 = arith.constant 0 : index
    %107 = vector.load %arg6[%c0_36, %c0_37] : memref<16x32xf32, #tpu.memory_space<vmem>>, vector<16x32xf32>
    tpu.vector_store %arg6[%c0_36, %c0_37], %106 {strides = array<i32>} : memref<16x32xf32, #tpu.memory_space<vmem>>, vector<16x32xf32>,
    return
  }
  func.func @transform_0(%arg0: i32) -> (i32, i32) {
    %c0_i32 = arith.constant 0 : i32
    %c0_i32_0 = arith.constant 0 : i32
    %c0_i32_1 = arith.constant 0 : i32
    return %c0_i32, %c0_i32_0 : i32, i32
  }
  func.func @transform_1(%arg0: i32) -> (i32, i32) {
    %c0_i32 = arith.constant 0 : i32
    %c0_i32_0 = arith.constant 0 : i32
    %c0_i32_1 = arith.constant 0 : i32
    return %c0_i32, %c0_i32_0 : i32, i32
  }
  func.func @transform_2(%arg0: i32) -> (i32, i32, i32) {
    %c0_i32 = arith.constant 0 : i32
    %c0_i32_0 = arith.constant 0 : i32
    %c0_i32_1 = arith.constant 0 : i32
    %c0_i32_2 = arith.constant 0 : i32
    return %c0_i32, %c0_i32_0, %c0_i32_1 : i32, i32, i32
  }
  func.func @transform_3(%arg0: i32) -> (i32, i32) {
    %c0_i32 = arith.constant 0 : i32
    %c0_i32_0 = arith.constant 0 : i32
    %c0_i32_1 = arith.constant 0 : i32
    return %c0_i32, %c0_i32_0 : i32, i32
  }
  func.func @transform_4(%arg0: i32) -> (i32, i32) {
    %c0_i32 = arith.constant 0 : i32
    %c0_i32_0 = arith.constant 0 : i32
    %c0_i32_1 = arith.constant 0 : i32
    return %c0_i32, %c0_i32_0 : i32, i32
  }
  func.func @transform_5(%arg0: i32) -> (i32, i32) {
    %c0_i32 = arith.constant 0 : i32
    %c0_i32_0 = arith.constant 0 : i32
    %c0_i32_1 = arith.constant 0 : i32
    return %c0_i32, %c0_i32_0 : i32, i32
  }
}

</mosaic_0001>

<bundles_post_ra>
// kernel: multi_head_attention.1
= control target key start
LH: loop header
LB: loop body
LE: loop exit
PB: predicated region body
PF: predicated region fallthrough
CT: control target
= control target key end

     0   :  { %10 = vsyncpa [#allocation3], 0  ;;  %s801_s0 = inlined_call_operand.vmem [shape: bf16[16,32], index: 0, kind: input, shape index: {}]   ;;  %s802_s1 = inlined_call_operand.vmem [shape: bf16[32,96], index: 1, kind: input, shape index: {}]   ;;  %s803_s2 = inlined_call_operand.hbm [shape: bf16[4,8,32], index: 2, kind: input, shape index: {}]   ;;  %s804_s3 = inlined_call_operand.vmem [shape: f32[1,32], index: 3, kind: input, shape index: {}]   ;;  %s805_s4 = inlined_call_operand.hbm [shape: f32[16,16], index: 4, kind: input, shape index: {}]   ;;  %s806_s5 = inlined_call_operand.hbm [shape: f32[16,32], index: 5, kind: output, shape index: {}]  }
   0x1   :  { %11 = vsyncpa [#allocation6], 0 }
   0x2   :  { %12 = vsyncpa [#allocation4], 0  ;;  %s21_s20 = sshll.u32 %s803_s2, 4  ;;  %s649_s21 = smov [#allocation2]   ;;  %s22_s20 = int_to_ptr.hbm [resolvable:$true] %s21_s20 }
   0x3   :  { %s23_s22 = sshll.u32 %s649_s21, 4  ;;  %s36_s25 = sshll.u32 %s805_s4, 4  ;;  %s24_s22 = int_to_ptr.vmem [resolvable:$true] %s23_s22  ;;  %s37_s25 = int_to_ptr.hbm [resolvable:$true] %s36_s25 }
   0x4   :  { %s650_s26 = smov 64   ;;  %s651_s27 = smov 4  }
   0x5   :  { %29 = dma.hbm_to_vmem [thread:$0]  %s22_s20, 256, %s24_s22, [#allocation3], %s650_s26, %s650_s26, %s651_s27  }
   0x6   :  { %s652_s28 = smov [#allocation5]   ;;  %s653_s30 = smov 128  }
   0x7   :  { %s38_s29 = sshll.u32 %s652_s28, 4  ;;  %s654_s6 = smov 8   ;;  %s39_s29 = int_to_ptr.vmem [resolvable:$true] %s38_s29 }
   0x8   :  { %44 = dma.hbm_to_vmem [thread:$0]  %s37_s25, 256, %s39_s29, [#allocation6], %s653_s30, %s653_s30, %s654_s6  }
   0x9   :  { %643 = dma.done.wait [#allocation3], 256  }
   0xa   :  { %644 = vsyncadd [#allocation3], 4294967040 }
   0xb   :  { %645 = dma.done.wait [#allocation6], 256  }
   0xc   :  { %646 = vsyncadd [#allocation6], 4294967040  ;;  %v520_v0 = vld [vmem:[%s802_s1 + $0x8] sm:$0xff]  ;;  %v519_v1 = vld [vmem:[%s802_s1] sm:$0xff]  ;;  %vm77_vm0 = vcmask 261120   ;;  %s655_s11 = smov 96  }
   0xd   :  { %87 = vmatpush.bf16.msra.mxu0 %v520_v0  ;;  %v518_v2 = vld [vmem:[%s801_s0] sm:$0xff]  ;;  %vm105_vm1 = vcmask 64512   ;;  %v722_v9 = vld [vmem:[#allocation5] sm:$0xff]  ;;  %vm126_vm2 = vcmask 130048   ;;  %v726_v13 = vld [vmem:[#allocation5 + $0x8] sm:$0xff]  ;;  %s656_s0 = smov 88  }
   0xe   :  { %s657_s1 = smov 120   ;;  %v170_v37 = vld [vmem:[#allocation2] sm:$0xf]  ;;  %vm175_vm3 = vcmask 1043456   ;;  %s658_s12 = smov 80  }
   0xf   :  { %v177_v38 = vsel %vm175_vm3, %v170_v37, 0  ;;  %s659_s13 = smov 112   ;;  %s660_s14 = smov 56   ;;  %v263_v61 = vld [vmem:[#allocation2 + $0x4] sm:$0xf] }
  0x10   :  { %186 = vmatpush.bf16.msra.mxu3 %v177_v38  ;;  %s661_s15 = smov 72   ;;  %s662_s16 = smov 104   ;;  %v269_v63 = vsel %vm175_vm3, %v263_v61, 0 }
  0x11   :  { %88 = vmatpush.bf16.msra.mxu0 %v519_v1  ;;  %s664_s19 = smov 40   ;;  %s665_s20 = smov [#allocation7]  }
  0x12   :  { %s477_s21 = sshll.u32 %s665_s20, 4  ;;  %s479_s24 = sshll.u32 %s806_s5, 4  ;;  %s478_s21 = int_to_ptr.vmem [resolvable:$true] %s477_s21  ;;  %s480_s24 = int_to_ptr.hbm [resolvable:$true] %s479_s24 }
  0x14   :  { %505 = vmatmul.msk.bf16.vlgmr.msra.gmra.mxu0 %vm77_vm0, %v518_v2 }
  0x15   :  { %278 = vmatpush.bf16.msrb.mxu0 %v269_v63  ;;  %v355_v63 = vld [vmem:[#allocation2 + $0x8] sm:$0xf] }
  0x91   :  { %v90_v3 = vpop.f32.mrf.mxu0 }
  0x99   :  { %v92_v4 = vpop.f32.mrf.mxu0 }
  0x9a   :  { %v715_v5 = vpack.c.bf16 %v92_v4, %v90_v3 }
  0x9c   :  { %150 = vrot.lane.b32.xlu2 %v715_v5, %s650_s26  ;;  %103 = vrot.lane.b32.xlu0 %v715_v5, %s655_s11 }
  0xf6   :  { %v151_v6 = vpop.permute.xlu2 %150 }
  0xf7   :  { %163 = vmatpush.bf16.msra.mxu2 %v151_v6 }
 0x10e   :  { %v104_v7 = vpop.permute.xlu0 %103 }
 0x10f   :  { %v110_v8 = vsel %vm105_vm1, %v104_v7, 0 }
 0x110   :  { %119 = vmatpush.bf16.xpose.msra.mxu1 %v110_v8 }
 0x117   :  { %506 = vmatmul.msk.bf16.vlgmr.msra.gmra.mxu1 %vm105_vm1, %v715_v5 }
 0x194   :  { %v121_v10 = vpop.f32.mrf.mxu1 }
 0x195   :  { %v122_v11 = vadd.f32 %v121_v10, %v722_v9 }
 0x197   :  { %v127_v12 = vsel %vm126_vm2, %v122_v11, -inf }
 0x198   :  { %128 = vmax.xlane.f32.xlu0 %v127_v12 }
 0x19c   :  { %v123_v14 = vpop.f32.mrf.mxu1 }
 0x19d   :  { %v124_v15 = vadd.f32 %v123_v14, %v726_v13 }
 0x19f   :  { %v130_v16 = vsel %vm126_vm2, %v124_v15, -inf }
 0x1a0   :  { %131 = vmax.xlane.f32.xlu1 %v130_v16 }
 0x20b   :  { %v129_v17 = vpop.xlane.xlu0 %128 }
 0x20c   :  { %v133_v18 = vsub.f32 %v122_v11, %v129_v17 }
 0x20e   :  { %v135_v19 = vmul.f32 1.442695, %v133_v18 }
 0x210   :  { %539 = vpow2.f32 %v135_v19 }
 0x213   :  { %v132_v20 = vpop.xlane.xlu1 %131 }
 0x214   :  { %v134_v21 = vsub.f32 %v124_v15, %v132_v20 }
 0x216   :  { %v540_v22 = vpop.eup %539  ;;  %v137_v23 = vmul.f32 1.442695, %v134_v21 }
 0x217   :  { %v139_v24 = vsel %vm126_vm2, %v540_v22, 0.0 }
 0x218   :  { %541 = vpow2.f32 %v137_v23  ;;  %140 = vadd.xlane.f32.xlu1 %v139_v24 }
 0x21e   :  { %v542_v25 = vpop.eup %541 }
 0x21f   :  { %v142_v26 = vsel %vm126_vm2, %v542_v25, 0.0 }
 0x220   :  { %143 = vadd.xlane.f32.xlu2 %v142_v26 }
 0x231   :  { %197 = vrot.lane.b32.xlu1 %v715_v5, %s656_s0 }
 0x238   :  { %195 = vrot.lane.b32.xlu2 %v715_v5, %s657_s1 }
 0x28b   :  { %v141_v27 = vpop.xlane.xlu1 %140 }
 0x28c   :  { %543 = vrcp.f32 %v141_v27 }
 0x292   :  { %v544_v29 = vpop.eup %543 }
 0x293   :  { %v144_v28 = vpop.xlane.xlu2 %143  ;;  %v147_v31 = vmul.f32 %v544_v29, %v540_v22  ;;  %v767_v29 = vld [vmem:[%s804_s3] ss:$0 sm:$0xff]  ;;  %s663_s3 = smov 48  }
 0x294   :  { %545 = vrcp.f32 %v144_v28 }
 0x29a   :  { %v546_v30 = vpop.eup %545 }
 0x29b   :  { %v148_v32 = vmul.f32 %v546_v30, %v542_v25  ;;  %v196_v36 = vpop.permute.xlu2 %195 }
 0x29d   :  { %v149_v33 = vpack.c.bf16 %v148_v32, %v147_v31 }
 0x29f   :  { %507 = vmatmul.msk.bf16.vlgmr.msra.gmra.mxu2 %vm126_vm2, %v149_v33 }
 0x2a3   :  { %v198_v34 = vpop.permute.xlu1 %197 }
 0x2a4   :  { %v203_v35 = vsel %vm105_vm1, %v198_v34, 0 }
 0x2a5   :  { %212 = vmatpush.bf16.xpose.msrb.mxu2 %v203_v35 }
 0x2af   :  { %509 = vmatmul.msk.bf16.vlgmr.msrb.gmra.mxu2 %vm105_vm1, %v196_v36 }
 0x322   :  { %v165_v39 = vpop.f32.mrf.mxu2 }
 0x32a   :  { %v167_v40 = vpop.f32.mrf.mxu2 }
 0x32b   :  { %v171_v41 = vpack.c.bf16 %v167_v40, %v165_v39 }
 0x32d   :  { %508 = vmatmul.msk.bf16.vlgmr.msra.gmra.mxu3 %vm105_vm1, %v171_v41 }
 0x332   :  { %v214_v42 = vpop.f32.mrf.mxu2 }
 0x333   :  { %v215_v43 = vadd.f32 %v214_v42, %v722_v9 }
 0x335   :  { %v219_v44 = vsel %vm126_vm2, %v215_v43, -inf }
 0x336   :  { %220 = vmax.xlane.f32.xlu2 %v219_v44 }
 0x33a   :  { %v216_v45 = vpop.f32.mrf.mxu2 }
 0x33b   :  { %v217_v46 = vadd.f32 %v216_v45, %v726_v13 }
 0x33d   :  { %v222_v47 = vsel %vm126_vm2, %v217_v46, -inf }
 0x33e   :  { %223 = vmax.xlane.f32.xlu1 %v222_v47 }
 0x34e   :  { %289 = vrot.lane.b32.xlu2 %v715_v5, %s658_s12 }
 0x357   :  { %287 = vrot.lane.b32.xlu1 %v715_v5, %s659_s13 }
 0x3a9   :  { %v221_v48 = vpop.xlane.xlu2 %220 }
 0x3aa   :  { %v225_v49 = vsub.f32 %v215_v43, %v221_v48 }
 0x3ac   :  { %v227_v50 = vmul.f32 1.442695, %v225_v49 }
 0x3ae   :  { %547 = vpow2.f32 %v227_v50 }
 0x3b0   :  { %v188_v19 = vpop.f32.mrf.mxu3 }
 0x3b1   :  { %v224_v51 = vpop.xlane.xlu1 %223  ;;  %v290_v52 = vpop.permute.xlu2 %289  ;;  %v193_v30 = vadd.f32 %v767_v29, %v188_v19 }
 0x3b2   :  { %v226_v53 = vsub.f32 %v217_v46, %v224_v51  ;;  %v295_v54 = vsel %vm105_vm1, %v290_v52, 0 }
 0x3b3   :  { %304 = vmatpush.bf16.xpose.msrb.mxu1 %v295_v54 }
 0x3b4   :  { %v548_v55 = vpop.eup %547  ;;  %v229_v56 = vmul.f32 1.442695, %v226_v53 }
 0x3b5   :  { %v231_v57 = vsel %vm126_vm2, %v548_v55, 0.0 }
 0x3b6   :  { %549 = vpow2.f32 %v229_v56  ;;  %232 = vadd.xlane.f32.xlu0 %v231_v57 }
 0x3b8   :  { %v759_v23 = vpop.f32.mrf.mxu3 }
 0x3bc   :  { %v550_v58 = vpop.eup %549 }
 0x3bd   :  { %v234_v59 = vsel %vm126_vm2, %v550_v58, 0.0 }
 0x3be   :  { %235 = vadd.xlane.f32.xlu0 %v234_v59 }
 0x3c9   :  { %v288_v60 = vpop.permute.xlu1 %287 }
 0x3ca   :  { %512 = vmatmul.msk.bf16.vlgmr.msrb.gmra.mxu1 %vm105_vm1, %v288_v60 }
 0x3d2   :  { %242 = vrot.lane.b32.xlu0 %v715_v5, %s660_s14 }
 0x3da   :  { %381 = vrot.lane.b32.xlu0 %v715_v5, %s661_s15 }
 0x3e2   :  { %379 = vrot.lane.b32.xlu0 %v715_v5, %s662_s16 }
 0x429   :  { %v233_v62 = vpop.xlane.xlu0 %232 }
 0x431   :  { %v236_v0 = vpop.xlane.xlu0 %235 }
 0x432   :  { %551 = vrcp.f32 %v236_v0  ;;  %v361_v0 = vsel %vm175_vm3, %v355_v63, 0 }
 0x433   :  { %553 = vrcp.f32 %v233_v62 }
 0x438   :  { %v552_v1 = vpop.eup %551 }
 0x439   :  { %v554_v2 = vpop.eup %553  ;;  %v240_v3 = vmul.f32 %v552_v1, %v550_v58 }
 0x43a   :  { %v239_v4 = vmul.f32 %v554_v2, %v548_v55 }
 0x43c   :  { %v241_v7 = vpack.c.bf16 %v240_v3, %v239_v4 }
 0x444   :  { %v243_v6 = vpop.permute.xlu0 %242 }
 0x445   :  { %255 = vmatpush.bf16.msrb.mxu3 %v243_v6 }
 0x447   :  { %v306_v8 = vpop.f32.mrf.mxu1 }
 0x448   :  { %v307_v10 = vadd.f32 %v306_v8, %v722_v9  ;;  %510 = vmatmul.msk.bf16.vlgmr.msrb.gmra.mxu3 %vm126_vm2, %v241_v7 }
 0x449   :  { %370 = vmatpush.bf16.msra.mxu3 %v361_v0 }
 0x44a   :  { %v311_v11 = vsel %vm126_vm2, %v307_v10, -inf }
 0x44b   :  { %312 = vmax.xlane.f32.xlu0 %v311_v11  ;;  %v447_v11 = vld [vmem:[#allocation2 + $0xc] sm:$0xf] }
 0x44c   :  { %v382_v12 = vpop.permute.xlu0 %381 }
 0x44d   :  { %v387_v14 = vsel %vm105_vm1, %v382_v12, 0  ;;  %v453_v12 = vsel %vm175_vm3, %v447_v11, 0 }
 0x44e   :  { %396 = vmatpush.bf16.xpose.msra.mxu0 %v387_v14 }
 0x44f   :  { %v308_v15 = vpop.f32.mrf.mxu1 }
 0x450   :  { %v309_v16 = vadd.f32 %v308_v15, %v726_v13 }
 0x452   :  { %v314_v17 = vsel %vm126_vm2, %v309_v16, -inf }
 0x453   :  { %315 = vmax.xlane.f32.xlu2 %v314_v17 }
 0x454   :  { %v380_v18 = vpop.permute.xlu0 %379 }
 0x4be   :  { %v313_v20 = vpop.xlane.xlu0 %312 }
 0x4bf   :  { %v317_v21 = vsub.f32 %v307_v10, %v313_v20 }
 0x4c1   :  { %v319_v22 = vmul.f32 1.442695, %v317_v21  ;;  %v194_v21 = vadd.f32 %v767_v29, %v759_v23 }
 0x4c3   :  { %555 = vpow2.f32 %v319_v22 }
 0x4c6   :  { %v316_v33 = vpop.xlane.xlu2 %315 }
 0x4c7   :  { %v318_v35 = vsub.f32 %v309_v16, %v316_v33 }
 0x4c9   :  { %v556_v24 = vpop.eup %555  ;;  %v321_v36 = vmul.f32 1.442695, %v318_v35 }
 0x4ca   :  { %v323_v25 = vsel %vm126_vm2, %v556_v24, 0.0 }
 0x4cb   :  { %v257_v26 = vpop.f32.mrf.mxu3  ;;  %324 = vadd.xlane.f32.xlu2 %v323_v25  ;;  %557 = vpow2.f32 %v321_v36 }
 0x4d1   :  { %v558_v40 = vpop.eup %557 }
 0x4d2   :  { %v326_v43 = vsel %vm126_vm2, %v558_v40, 0.0 }
 0x4d3   :  { %v259_v27 = vpop.f32.mrf.mxu3 }
 0x4d4   :  { %v264_v28 = vpack.c.bf16 %v259_v27, %v257_v26 }
 0x4d6   :  { %511 = vmatmul.msk.bf16.vlgmr.msrb.gmra.mxu0 %vm105_vm1, %v264_v28 }
 0x4e6   :  { %515 = vmatmul.msk.bf16.vlgmr.msra.gmra.mxu0 %vm105_vm1, %v380_v18 }
 0x53e   :  { %v325_v53 = vpop.xlane.xlu2 %324 }
 0x553   :  { %v280_v31 = vpop.f32.mrf.mxu0 }
 0x554   :  { %v770_v32 = vadd.f32 %v280_v31, %v193_v30 }
 0x55b   :  { %v772_v34 = vpop.f32.mrf.mxu0 }
 0x563   :  { %v398_v37 = vpop.f32.mrf.mxu0 }
 0x564   :  { %v399_v38 = vadd.f32 %v398_v37, %v722_v9 }
 0x566   :  { %v403_v39 = vsel %vm126_vm2, %v399_v38, -inf }
 0x567   :  { %404 = vmax.xlane.f32.xlu1 %v403_v39 }
 0x56b   :  { %v400_v41 = vpop.f32.mrf.mxu0 }
 0x56c   :  { %v401_v42 = vadd.f32 %v400_v41, %v726_v13 }
 0x56e   :  { %v406_v44 = vsel %vm126_vm2, %v401_v42, -inf }
 0x56f   :  { %327 = vadd.xlane.f32.xlu1 %v326_v43  ;;  %407 = vmax.xlane.f32.xlu0 %v406_v44 }
 0x588   :  { %334 = vrot.lane.b32.xlu1 %v715_v5, %s663_s3 }
 0x5da   :  { %v405_v45 = vpop.xlane.xlu1 %404 }
 0x5db   :  { %v409_v46 = vsub.f32 %v399_v38, %v405_v45 }
 0x5dd   :  { %v411_v9 = vmul.f32 1.442695, %v409_v46 }
 0x5df   :  { %559 = vpow2.f32 %v411_v9 }
 0x5e2   :  { %v408_v47 = vpop.xlane.xlu0 %407  ;;  %v328_v13 = vpop.xlane.xlu1 %327 }
 0x5e3   :  { %v410_v48 = vsub.f32 %v401_v42, %v408_v47 }
 0x5e5   :  { %v560_v49 = vpop.eup %559  ;;  %v413_v50 = vmul.f32 1.442695, %v410_v48 }
 0x5e6   :  { %v415_v51 = vsel %vm126_vm2, %v560_v49, 0.0 }
 0x5e7   :  { %561 = vpow2.f32 %v413_v50  ;;  %416 = vadd.xlane.f32.xlu0 %v415_v51 }
 0x5e8   :  { %563 = vrcp.f32 %v328_v13 }
 0x5e9   :  { %565 = vrcp.f32 %v325_v53 }
 0x5ed   :  { %v562_v52 = vpop.eup %561 }
 0x5ee   :  { %v418_v54 = vsel %vm126_vm2, %v562_v52, 0.0  ;;  %v564_v55 = vpop.eup %563 }
 0x5ef   :  { %419 = vadd.xlane.f32.xlu2 %v418_v54  ;;  %v566_v56 = vpop.eup %565  ;;  %v332_v57 = vmul.f32 %v564_v55, %v558_v40 }
 0x5f0   :  { %v331_v58 = vmul.f32 %v566_v56, %v556_v24  ;;  %v286_v24 = vadd.f32 %v772_v34, %v194_v21 }
 0x5f2   :  { %v333_v60 = vpack.c.bf16 %v332_v57, %v331_v58 }
 0x5fa   :  { %v335_v59 = vpop.permute.xlu1 %334 }
 0x5fb   :  { %347 = vmatpush.bf16.msra.mxu2 %v335_v59  ;;  %426 = vrot.lane.b32.xlu0 %v715_v5, %s664_s19 }
 0x5fe   :  { %513 = vmatmul.msk.bf16.vlgmr.msra.gmra.mxu2 %vm126_vm2, %v333_v60 }
 0x5ff   :  { %462 = vmatpush.bf16.msrb.mxu2 %v453_v12 }
 0x65a   :  { %v417_v61 = vpop.xlane.xlu0 %416 }
 0x662   :  { %v420_v62 = vpop.xlane.xlu2 %419 }
 0x663   :  { %567 = vrcp.f32 %v420_v62 }
 0x664   :  { %569 = vrcp.f32 %v417_v61 }
 0x669   :  { %v568_v1 = vpop.eup %567 }
 0x66a   :  { %v570_v2 = vpop.eup %569  ;;  %v424_v3 = vmul.f32 %v568_v1, %v562_v52 }
 0x66b   :  { %v423_v4 = vmul.f32 %v570_v2, %v560_v49 }
 0x66d   :  { %v427_v6 = vpop.permute.xlu0 %426  ;;  %v425_v7 = vpack.c.bf16 %v424_v3, %v423_v4 }
 0x66e   :  { %439 = vmatpush.bf16.msra.mxu1 %v427_v6 }
 0x671   :  { %516 = vmatmul.msk.bf16.vlgmr.msra.gmra.mxu1 %vm126_vm2, %v425_v7 }
 0x681   :  { %v349_v5 = vpop.f32.mrf.mxu2 }
 0x689   :  { %v351_v8 = vpop.f32.mrf.mxu2 }
 0x68a   :  { %v356_v10 = vpack.c.bf16 %v351_v8, %v349_v5 }
 0x68c   :  { %514 = vmatmul.msk.bf16.vlgmr.msra.gmra.mxu3 %vm105_vm1, %v356_v10 }
 0x6ee   :  { %v441_v14 = vpop.f32.mrf.mxu1 }
 0x6f6   :  { %v443_v15 = vpop.f32.mrf.mxu1 }
 0x6f7   :  { %v448_v16 = vpack.c.bf16 %v443_v15, %v441_v14 }
 0x6f9   :  { %517 = vmatmul.msk.bf16.vlgmr.msrb.gmra.mxu2 %vm105_vm1, %v448_v16 }
 0x70f   :  { %v372_v17 = vpop.f32.mrf.mxu3 }
 0x710   :  { %v377_v18 = vadd.f32 %v372_v17, %v770_v32 }
 0x717   :  { %v374_v22 = vpop.f32.mrf.mxu3 }
 0x718   :  { %v378_v25 = vadd.f32 %v374_v22, %v286_v24 }
 0x77c   :  { %v464_v19 = vpop.f32.mrf.mxu2 }
 0x77d   :  { %v469_v20 = vadd.f32 %v464_v19, %v377_v18 }
 0x77f   :  { %471 = vst.msk [vmem:[#allocation7] sm:$0xff] %vm77_vm0, %v469_v20 }
 0x784   :  { %v466_v26 = vpop.f32.mrf.mxu2 }
 0x785   :  { %v470_v27 = vadd.f32 %v466_v26, %v378_v25 }
 0x787   :  { %472 = vst.msk [vmem:[#allocation7 + $0x8] sm:$0xff] %vm77_vm0, %v470_v27 }
 0x788   :  { %485 = dma.vmem_to_hbm [thread:$0]  %s478_s21, 256, %s480_s24, [#allocation4], %s653_s30, %s653_s30, %s654_s6  }
 0x789   :  { %647 = dma.done.wait [#allocation4], 256  }
 0x78a   :  { %648 = vsyncadd [#allocation4], 4294967040 }
 0x78b   :  { %490 = vsyncpa [#allocation3], 1 }
 0x78c   :  { %491 = vsyncpa [#allocation6], 1 }
 0x78d   :  { %492 = vsyncpa [#allocation4], 1 }

</bundles_post_ra>
